<compile_context>
chip_gen: v5e
topology: v5e:2x2
jax: 0.10.0
libtpu: 0.0.40
codegen_flags: <defaults>
</compile_context>

<pallas_src>
import jax
import jax.numpy as jnp
from jax.experimental import pallas as pl
from jax.experimental.pallas import tpu as pltpu


def glu_kernel(x_ref, w_ref, b_ref, o_ref):
    """Fused GLU for one (1, C, TN) channel-major block.

    x_ref : (1, C, TN)  block of the NCHW input, spatial flattened to lanes
    w_ref : (C, C)      nn.Linear weight (out_features, in_features), resident
    b_ref : (C, 1)      nn.Linear bias as a column, resident
    o_ref : (1, C, TN)  output block (same layout as input)
    """
    x = x_ref[0]                                                  # (C, TN)
    # lin[o, p] = sum_c W[o, c] * x[c, p] + bias[o]   (== nn.Linear over C)
    lin = jnp.dot(w_ref[...], x, preferred_element_type=jnp.float32) + b_ref[...]
    sig = 1.0 / (1.0 + jnp.exp(-x))       # exp on EUP; recip/add/mul on VPU
    o_ref[0] = (lin * sig).astype(o_ref.dtype)


def glu_forward(x_nchw, w, b, *, block_cols=512):
    """Pallas equivalent of GLU.forward.

    x_nchw: (B, C, H, W) float32 input (PyTorch NCHW layout)
    w     : (C, C) PyTorch nn.Linear weight (out_features, in_features)
    b     : (C,)   PyTorch nn.Linear bias
    returns (B, C, H, W) float32
    """
    B, C, H, W = x_nchw.shape
    P = H * W

    x3d = x_nchw.reshape(B, C, P)   # free reshape, no transpose
    b2d = b.reshape(C, 1)           # column bias, broadcasts over lanes

    # Spatial tile: largest power-of-two multiple of 128 that divides P and
    # is <= block_cols; otherwise fall back to the full (legal) extent.
    tn = P
    if P % 128 == 0:
        tn = 128
        while tn * 2 <= min(P, block_cols) and P % (tn * 2) == 0:
            tn *= 2

    out3d = pl.pallas_call(
        glu_kernel,
        out_shape=jax.ShapeDtypeStruct((B, C, P), jnp.float32),
        grid_spec=pltpu.PrefetchScalarGridSpec(
            num_scalar_prefetch=0,
            grid=(B, P // tn),
            in_specs=[
                pl.BlockSpec((1, C, tn), lambda i, j: (i, 0, j)),  # activations
                pl.BlockSpec((C, C), lambda i, j: (0, 0)),         # weight (resident)
                pl.BlockSpec((C, 1), lambda i, j: (0, 0)),         # bias   (resident)
            ],
            out_specs=pl.BlockSpec((1, C, tn), lambda i, j: (i, 0, j)),
        ),
        compiler_params=pltpu.CompilerParams(
            dimension_semantics=("parallel", "parallel")),  # v7x: 2 TCs split grid
    )(x3d, w, b2d)

    return out3d.reshape(B, C, H, W)


def glu_reference(x_nchw, w, b):
    """Pure-JAX reference replicating the PyTorch module exactly."""
    xp = jnp.transpose(x_nchw, (0, 2, 3, 1))          # NCHW -> NHWC
    lin = jnp.einsum("bhwc,oc->bhwo", xp, w) + b      # nn.Linear over channels
    lin = jnp.transpose(lin, (0, 3, 1, 2))            # back to NCHW
    return lin * jax.nn.sigmoid(x_nchw)


if __name__ == "__main__":
    # Small shapes consistent with where GLU sits in the CNN
    # (batch, channels, n_frames, n_freq); C=128 keeps the matmul MXU-sized.
    B, C, H, W = 2, 128, 8, 16

    key = jax.random.PRNGKey(0)
    k_x, k_w, k_b = jax.random.split(key, 3)
    x = jax.random.normal(k_x, (B, C, H, W), jnp.float32)
    w = jax.random.normal(k_w, (C, C), jnp.float32) * (1.0 / jnp.sqrt(C))
    b = jax.random.normal(k_b, (C,), jnp.float32) * 0.1

    out = jax.block_until_ready(glu_forward(x, w, b))
    ref = jax.block_until_ready(glu_reference(x, w, b))

    assert out.shape == (B, C, H, W), out.shape
    assert jnp.allclose(out, ref, atol=1e-4, rtol=1e-4), \
        float(jnp.max(jnp.abs(out - ref)))

    print("KERNEL_OK")
</pallas_src>

<mosaic_0001>
module attributes {stable_mosaic.version = 11 : i64} {
  func.func @glu_kernel(%arg0: i32, %arg1: i32, %arg2: memref<1x128x128xf32, #tpu.memory_space<vmem>>, %arg3: memref<128x128xf32, #tpu.memory_space<vmem>>, %arg4: memref<128x1xf32, #tpu.memory_space<vmem>>, %arg5: memref<1x128x128xf32, #tpu.memory_space<vmem>>) attributes {dimension_semantics = [#tpu.dimension_semantics<parallel>, #tpu.dimension_semantics<parallel>], iteration_bounds = array<i64: 2, 1>, scalar_prefetch = 0 : i64, scratch_operands = 0 : i64, tpu.core_type = #tpu.core_type<tc>, window_params = [{transform_indices = @transform_0, window_bounds = array<i64: 1, 128, 128>}, {pipeline_mode = #tpu.pipeline_mode<synchronous>, transform_indices = @transform_1, window_bounds = array<i64: 128, 128>}, {pipeline_mode = #tpu.pipeline_mode<synchronous>, transform_indices = @transform_2, window_bounds = array<i64: 128, 1>}, {transform_indices = @transform_3, window_bounds = array<i64: 1, 128, 128>}]} {
    %c0 = arith.constant 0 : index
    %c0_0 = arith.constant 0 : index
    %c0_1 = arith.constant 0 : index
    %0 = vector.load %arg2[%c0, %c0_0, %c0_1] : memref<1x128x128xf32, #tpu.memory_space<vmem>>, vector<1x128x128xf32>
    %1 = vector.shape_cast %0 : vector<1x128x128xf32> to vector<128x128xf32>
    %c0_2 = arith.constant 0 : index
    %c0_3 = arith.constant 0 : index
    %2 = vector.load %arg3[%c0_2, %c0_3] : memref<128x128xf32, #tpu.memory_space<vmem>>, vector<128x128xf32>
    %cst = arith.constant dense<0.000000e+00> : vector<128x128xf32>
    %3 = tpu.matmul %2, %1, %cst {dimension_numbers = #tpu.dot_dimension_numbers<[1], [0], [0], [1], [0, 0, 1, 1], [], []>} : vector<128x128xf32>, vector<128x128xf32>, vector<128x128xf32> -> vector<128x128xf32>
    %c0_4 = arith.constant 0 : index
    %c0_5 = arith.constant 0 : index
    %4 = vector.load %arg4[%c0_4, %c0_5] : memref<128x1xf32, #tpu.memory_space<vmem>>, vector<128x1xf32>
    %5 = vector.broadcast %4 : vector<128x1xf32> to vector<128x128xf32>
    %6 = arith.addf %3, %5 : vector<128x128xf32>
    %cst_6 = arith.constant 0.000000e+00 : f32
    %7 = vector.broadcast %cst_6 : f32 to vector<128x128xf32>
    %8 = arith.subf %7, %1 : vector<128x128xf32>
    %9 = math.exp %8 : vector<128x128xf32>
    %cst_7 = arith.constant 1.000000e+00 : f32
    %10 = vector.broadcast %cst_7 : f32 to vector<128x128xf32>
    %11 = arith.addf %10, %9 : vector<128x128xf32>
    %cst_8 = arith.constant 1.000000e+00 : f32
    %12 = vector.broadcast %cst_8 : f32 to vector<128x128xf32>
    %13 = arith.divf %12, %11 : vector<128x128xf32>
    %14 = arith.mulf %6, %13 : vector<128x128xf32>
    %c0_9 = arith.constant 0 : index
    %c0_10 = arith.constant 0 : index
    %c0_11 = arith.constant 0 : index
    %15 = vector.load %arg5[%c0_9, %c0_10, %c0_11] : memref<1x128x128xf32, #tpu.memory_space<vmem>>, vector<1x128x128xf32>
    %16 = vector.shape_cast %15 : vector<1x128x128xf32> to vector<128x128xf32>
    %17 = vector.shape_cast %14 : vector<128x128xf32> to vector<1x128x128xf32>
    tpu.vector_store %arg5[%c0_9, %c0_10, %c0_11], %17 {strides = array<i32>} : memref<1x128x128xf32, #tpu.memory_space<vmem>>, vector<1x128x128xf32>,
    return
  }
  func.func @transform_0(%arg0: i32, %arg1: i32) -> (i32, i32, i32) {
    %c0_i32 = arith.constant 0 : i32
    %c0_i32_0 = arith.constant 0 : i32
    return %arg0, %c0_i32, %arg1 : i32, i32, i32
  }
  func.func @transform_1(%arg0: i32, %arg1: i32) -> (i32, i32) {
    %c0_i32 = arith.constant 0 : i32
    %c0_i32_0 = arith.constant 0 : i32
    %c0_i32_1 = arith.constant 0 : i32
    return %c0_i32, %c0_i32_0 : i32, i32
  }
  func.func @transform_2(%arg0: i32, %arg1: i32) -> (i32, i32) {
    %c0_i32 = arith.constant 0 : i32
    %c0_i32_0 = arith.constant 0 : i32
    %c0_i32_1 = arith.constant 0 : i32
    return %c0_i32, %c0_i32_0 : i32, i32
  }
  func.func @transform_3(%arg0: i32, %arg1: i32) -> (i32, i32, i32) {
    %c0_i32 = arith.constant 0 : i32
    %c0_i32_0 = arith.constant 0 : i32
    return %arg0, %c0_i32, %arg1 : i32, i32, i32
  }
}

</mosaic_0001>

<bundles_post_ra>
// kernel: tpu_custom_call.1
= control target key start
LH: loop header
LB: loop body
LE: loop exit
PB: predicated region body
PF: predicated region fallthrough
CT: control target
= control target key end

     0   :  { %8 = vsyncpa [#allocation3], 0  ;;  %s2043_s0 = inlined_call_operand.hbm [shape: f32[2,128,128], index: 0, kind: input, shape index: {}]   ;;  %s2044_s1 = inlined_call_operand.vmem [shape: f32[128,128], index: 1, kind: input, shape index: {}]   ;;  %s2045_s2 = inlined_call_operand.vmem [shape: f32[128,1], index: 2, kind: input, shape index: {}]   ;;  %s2046_s3 = inlined_call_operand.hbm [shape: f32[2,128,128], index: 3, kind: output, shape index: {}]  }
   0x1   :  { %10 = vsyncpa [#allocation3 + $0x1], 0 }
   0x2   :  { %11 = vsyncpa [#allocation4], 0 }
   0x3   :  { %13 = vsyncpa [#allocation4 + $0x1], 0  ;;  %s1177_s12 = smov 0   ;;  %s1179_s13 = smov 0  }
   0x4   :  { %s1181_s14 = smov 0   ;;  %s1183_s15 = smov 0  }
   0x5   :  { %s1185_s16 = smov 0   ;;  %s1187_s17 = smov 0  }
   0x6 LB: > { %s839_s18 = sadd.s32 4294967295, %s1150_s17   ;;  %s840_s19 = sadd.s32 4294967294, %s1150_s17   ;;  %s1150_s17 = sphi %s1187_s17, %s19_s17   ;;  %s1146_s16 = sphi %s1185_s16, %s2113_s16   ;;  %s1142_s15 = sphi %s1183_s15, %s2112_s15   ;;  %s1138_s14 = sphi %s1181_s14, %s2111_s14   ;;  %s1134_s13 = sphi %s1179_s13, %s2110_s13   ;;  %s1130_s12 = sphi %s1177_s12, %s2109_s12  }
   0x7   : > { %s31_s20 = sadd.s32 1, %s1146_s16  ;;  %s40_s21 = sadd.s32 1, %s1138_s14 }
   0x8   : > { %p33_p0 = scmp.ge.s32.totalorder %s31_s20, 2  ;;  %p47_p1 = scmp.ne.s32.totalorder %s1138_s14, %s1134_s13 }
   0x9   : > { %p48_p2 = scmp.eq.s32.totalorder %s1150_s17, 0  ;;  %p53_p3 = scmp.ne.s32.totalorder %s1134_s13, %s1130_s12 }
   0xa   : > { %s2115_s20 = smov (%p33_p0, %s31_s20), 0  ;;  %p54_p5 = scmp.eq.s32.totalorder %s839_s18, 0 }
   0xb   : > { %p1218_p4 = por %p48_p2, %p47_p1  ;;  %s35_s23 = ssub.s32 %s1146_s16, %s2115_s20 }
   0xc   : > { %p121_p6 = scmp.eq.s32.totalorder %s839_s18, 1  ;;  %p38_p7 = scmp.eq.s32.totalorder %s35_s23, 0 }
   0xd   : > { %p1224_p8 = por %p54_p5, %p53_p3  ;;  %p127_p10 = scmp.eq.s32.totalorder %s840_s19, 1 }
   0xe   : > { %p1228_p9 = por %p121_p6, %p47_p1  ;;  %p842_p12 = scmp.ge.s32.totalorder %s1150_s17, 2 }
   0xf   : > { %s1233_s26 = scalar_select %p38_p7, %s1138_s14, %s40_s21  }
  0x10   : > { %p1235_p11 = por %p127_p10, %p53_p3  ;;  %p916_p13 = scmp.lt.s32.totalorder %s1150_s17, 2 }
  0x11   : > { %s153_s28 = sand.u32 1, %s1138_s14   ;;  %s854_s30 = sshll.u32 %s1146_s16, 7 }
  0x12   : > { %s843_s29 = sshll.u32 %s153_s28, 7  ;;  %s163_s6 = scalar_lea.hbm %s2043_s0, %s854_s30 }
  0x13   : > { %s157_s7 = scalar_lea.vmem [#allocation2], %s843_s29  ;;  %s164_s9 = sshll.u32 %s163_s6, 4  ;;  %s165_s9 = int_to_ptr.hbm [resolvable:$true] %s164_s9 }
  0x14   : > { %s166_s8 = sshll.u32 %s157_s7, 4  ;;  %p909_p0 = pnand %p916_p13, %p1218_p4  ;;  %s167_s8 = int_to_ptr.vmem [resolvable:$true] %s166_s8 }
  0x15   : > { %p846_p1 = scmp.ge.s32.totalorder %s1150_s17, 1  ;;  %s154_s10 = scalar_lea.sflag [#allocation3], %s153_s28 }
  0x16   : > { %s1152_s11 = smov 128   ;;  %s1153_s18 = smov 8  }
  0x17   : > { %911 = dma.hbm_to_vmem [thread:$0]  (!%p909_p0), %s165_s9, 2048, %s167_s8, %s154_s10, %s1152_s11, %s1152_s11, %s1153_s18  }
  0x18   : > { %p174_p2 = scmp.lt.s32.totalorder %s1150_s17, 3 }
  0x1a   : > { %p175_p3 = pnand %p846_p1, %p174_p2 }
  0x1b   : > { %s1251_s19 = sand.u32 (!%p175_p3), 1, %s1134_s13  }
  0x1c   : > { %178 = sbr.rel (%p175_p3) target bundleno = 238 (0xee), region = 32  ;;  %s847_s21 = sshll.u32 (!%p175_p3), %s1251_s19, 7 }
  0x1d   : > { %s181_s23 = scalar_lea.sflag (!%p175_p3), [#allocation3], %s1251_s19  ;;  %s1257_s22 = scalar_lea.vmem (!%p175_p3), [#allocation2], %s847_s21 }
  0x21   : > { %1121 = dma.done.wait (%p1224_p8), %s181_s23, 2048  }
  0x22   : > { %1123 = vsyncadd (%p1224_p8), %s181_s23, 4294965248  ;;  %v1154_v0 = vmov 0   ;;  %v240_v1 = vld [vmem:[%s2045_s2] sm:$0xff]  ;;  %v1267_v2 = vld [vmem:[%s1257_s22 + $0x78] sm:$0xff]  ;;  %s1829_s4 = scalar_lea.vmem [#allocation5], %s847_s21  ;;  %s855_s21 = sshll.u32 %s1142_s15, 7 }
  0x23   : > { %971 = vset.pattern.permute.xlu0 %v1154_v0  ;;  %972 = vset.pattern.permute.xlu1 %v1154_v0  ;;  %v1270_v3 = vld [vmem:[%s1257_s22 + $0x70] sm:$0xff]  ;;  %v1276_v4 = vld [vmem:[%s1257_s22 + $0x68] sm:$0xff]  ;;  %v1283_v5 = vld [vmem:[%s1257_s22 + $0x60] sm:$0xff]  ;;  %v416_v55 = vsub.f32 0.0, %v1267_v2  ;;  %s750_s6 = scalar_lea.hbm %s2046_s3, %s855_s21  ;;  %s751_s7 = sshll.u32 %s1829_s4, 4  ;;  %s752_s7 = int_to_ptr.vmem [resolvable:$true] %s751_s7 }
  0x24   : > { %973 = vset.pattern.permute.xlu2 %v1154_v0  ;;  %258 = vperm.xlu0 %971, %v240_v1   ;;  %v242_v6 = vld [vmem:[%s2045_s2 + $0x10] sm:$0xff]  ;;  %v241_v7 = vld [vmem:[%s2045_s2 + $0x8] sm:$0xff]  ;;  %v1298_v8 = vld [vmem:[%s1257_s22 + $0x58] sm:$0xff]  ;;  %v413_v52 = vsub.f32 0.0, %v1283_v5  ;;  %v415_v56 = vsub.f32 0.0, %v1270_v3  ;;  %v414_v57 = vsub.f32 0.0, %v1276_v4 }
  0x25   : > { %336 = vmatpush.msra.mxu0 %v1267_v2  ;;  %856 = vmatpush.msra.mxu1 %v1267_v2  ;;  %v1304_v9 = vld [vmem:[%s1257_s22 + $0x50] sm:$0xff]  ;;  %v1310_v10 = vld [vmem:[%s1257_s22 + $0x48] sm:$0xff]  ;;  %v1317_v11 = vld [vmem:[%s1257_s22 + $0x40] sm:$0xff]  ;;  %v447_v61 = vmul.f32 1.442695, %v416_v55  ;;  %v412_v0 = vsub.f32 0.0, %v1298_v8 }
  0x26   : > { %857 = vmatpush.msra.mxu2 %v1267_v2  ;;  %858 = vmatpush.msra.mxu3 %v1267_v2  ;;  %v243_v12 = vld [vmem:[%s2045_s2 + $0x18] sm:$0xff]  ;;  %v246_v13 = vld [vmem:[%s2045_s2 + $0x30] sm:$0xff]  ;;  %v1344_v16 = vld [vmem:[%s1257_s22 + $0x28] sm:$0xff]  ;;  %v409_v54 = vsub.f32 0.0, %v1317_v11  ;;  %v441_v58 = vmul.f32 1.442695, %v413_v52 }
  0x27   : > { %337 = vmatpush.msra.mxu0 %v1270_v3  ;;  %859 = vmatpush.msra.mxu1 %v1270_v3  ;;  %v1332_v14 = vld [vmem:[%s1257_s22 + $0x38] sm:$0xff]  ;;  %v1338_v15 = vld [vmem:[%s1257_s22 + $0x30] sm:$0xff]  ;;  %v1351_v17 = vld [vmem:[%s1257_s22 + $0x20] sm:$0xff]  ;;  %v445_v63 = vmul.f32 1.442695, %v415_v56  ;;  %s753_s8 = sshll.u32 %s750_s6, 4  ;;  %s754_s8 = int_to_ptr.hbm [resolvable:$true] %s753_s8 }
  0x28   : > { %860 = vmatpush.msra.mxu2 %v1270_v3  ;;  %861 = vmatpush.msra.mxu3 %v1270_v3  ;;  %v247_v18 = vld [vmem:[%s2045_s2 + $0x38] sm:$0xff]  ;;  %v249_v19 = vld [vmem:[%s2045_s2 + $0x48] sm:$0xff]  ;;  %v1372_v21 = vld [vmem:[%s1257_s22 + $0x10] sm:$0xff]  ;;  %v405_v50 = vsub.f32 0.0, %v1351_v17  ;;  %v433_v59 = vmul.f32 1.442695, %v409_v54 }
  0x29   : > { %338 = vmatpush.msra.mxu0 %v1276_v4  ;;  %862 = vmatpush.msra.mxu1 %v1276_v4  ;;  %v1366_v20 = vld [vmem:[%s1257_s22 + $0x18] sm:$0xff]  ;;  %v1378_v22 = vld [vmem:[%s1257_s22 + $0x8] sm:$0xff]  ;;  %v208_v23 = vld [vmem:[%s1257_s22] sm:$0xff]  ;;  %v443_v1 = vmul.f32 1.442695, %v414_v57  ;;  %v411_v3 = vsub.f32 0.0, %v1304_v9 }
  0x2a   : > { %863 = vmatpush.msra.mxu2 %v1276_v4  ;;  %864 = vmatpush.msra.mxu3 %v1276_v4  ;;  %v224_v24 = vld [vmem:[%s2044_s1] sm:$0xff]  ;;  %v250_v29 = vld [vmem:[%s2045_s2 + $0x50] sm:$0xff]  ;;  %v225_v31 = vld [vmem:[%s2044_s1 + $0x8] sm:$0xff]  ;;  %v401_v49 = vsub.f32 0.0, %v208_v23  ;;  %v425_v53 = vmul.f32 1.442695, %v405_v50 }
  0x2b   : > { %339 = vmatpush.msra.mxu0 %v1283_v5  ;;  %865 = vmatpush.msra.mxu1 %v1283_v5  ;;  %v228_v25 = vld [vmem:[%s2044_s1 + $0x20] sm:$0xff]  ;;  %v229_v32 = vld [vmem:[%s2044_s1 + $0x28] sm:$0xff]  ;;  %v255_v37 = vld [vmem:[%s2045_s2 + $0x78] sm:$0xff]  ;;  %v402_v60 = vsub.f32 0.0, %v1378_v22  ;;  %s738_s9 = scalar_lea.sflag [#allocation4], %s1251_s19  ;;  %s1082_s10 = sshra.s32 %s754_s8, 4  ;;  %s1083_s10 = int_to_ptr.hbm [resolvable:$true] %s1082_s10 }
  0x2c   : > { %866 = vmatpush.msra.mxu2 %v1283_v5  ;;  %867 = vmatpush.msra.mxu3 %v1283_v5  ;;  %v232_v26 = vld [vmem:[%s2044_s1 + $0x40] sm:$0xff]  ;;  %v233_v33 = vld [vmem:[%s2044_s1 + $0x48] sm:$0xff]  ;;  %v226_v38 = vld [vmem:[%s2044_s1 + $0x10] sm:$0xff]  ;;  %v417_v51 = vmul.f32 1.442695, %v401_v49  ;;  %v406_v5 = vsub.f32 0.0, %v1344_v16  ;;  %p1089_p7 = scmp.lt.s32.totalorder %s1083_s10, %s2046_s3 }
  0x2d   : > { %268 = vperm.xlu1 %972, %v242_v6   ;;  %263 = vperm.xlu0 %971, %v241_v7   ;;  %v236_v27 = vld [vmem:[%s2044_s1 + $0x60] sm:$0xff]  ;;  %v237_v34 = vld [vmem:[%s2044_s1 + $0x68] sm:$0xff]  ;;  %v230_v39 = vld [vmem:[%s2044_s1 + $0x30] sm:$0xff]  ;;  %v419_v2 = vmul.f32 1.442695, %v402_v60  ;;  %s1084_s11 = scalar_lea.hbm %s1083_s10, 128 }
  0x2e   : > { %340 = vmatpush.msra.mxu0 %v1298_v8  ;;  %868 = vmatpush.msra.mxu1 %v1298_v8  ;;  %v244_v28 = vld [vmem:[%s2045_s2 + $0x20] sm:$0xff]  ;;  %v245_v35 = vld [vmem:[%s2045_s2 + $0x28] sm:$0xff]  ;;  %v234_v40 = vld [vmem:[%s2044_s1 + $0x50] sm:$0xff]  ;;  %974 = vpow2.f32 %v417_v51  ;;  %v439_v7 = vmul.f32 1.442695, %v412_v0  ;;  %p1085_p4 = scmp.ne.s32.totalorder %s1083_s10, %s1084_s11  ;;  %s1088_s28 = scalar_lea.hbm %s2046_s3, 256 }
  0x2f   : > { %869 = vmatpush.msra.mxu2 %v1298_v8  ;;  %870 = vmatpush.msra.mxu3 %v1298_v8  ;;  %v252_v30 = vld [vmem:[%s2045_s2 + $0x60] sm:$0xff]  ;;  %v253_v36 = vld [vmem:[%s2045_s2 + $0x68] sm:$0xff]  ;;  %v238_v41 = vld [vmem:[%s2044_s1 + $0x70] sm:$0xff]  ;;  %976 = vpow2.f32 %v425_v53  ;;  %v427_v8 = vmul.f32 1.442695, %v406_v5  ;;  %p1090_p8 = scmp.lt.s32.totalorder %s1088_s28, %s1084_s11 }
  0x30   : > { %341 = vmatpush.msra.mxu0 %v1304_v9  ;;  %871 = vmatpush.msra.mxu1 %v1304_v9  ;;  %v248_v42 = vld [vmem:[%s2045_s2 + $0x40] sm:$0xff]  ;;  %v227_v43 = vld [vmem:[%s2044_s1 + $0x18] sm:$0xff]  ;;  %v254_v48 = vld [vmem:[%s2045_s2 + $0x70] sm:$0xff]  ;;  %978 = vpow2.f32 %v441_v58  ;;  %p1086_p5 = pnand %p1085_p4, %p1228_p9 }
  0x31   : > { %872 = vmatpush.msra.mxu2 %v1304_v9  ;;  %873 = vmatpush.msra.mxu3 %v1304_v9  ;;  %v231_v44 = vld [vmem:[%s2044_s1 + $0x38] sm:$0xff]  ;;  %980 = vpow2.f32 %v433_v59  ;;  %p1091_p10 = por %p1090_p8, %p1089_p7 }
  0x32   : > { %342 = vmatpush.msra.mxu0 %v1310_v10  ;;  %874 = vmatpush.msra.mxu1 %v1310_v10  ;;  %v235_v45 = vld [vmem:[%s2044_s1 + $0x58] sm:$0xff]  ;;  %982 = vpow2.f32 %v447_v61  ;;  %p1087_p6 = pneg %p1086_p5 }
  0x33   : > { %875 = vmatpush.msra.mxu2 %v1310_v10  ;;  %876 = vmatpush.msra.mxu3 %v1310_v10  ;;  %v239_v46 = vld [vmem:[%s2044_s1 + $0x78] sm:$0xff]  ;;  %984 = vpow2.f32 %v445_v63 }
  0x34   : > { %343 = vmatpush.msra.mxu0 %v1317_v11  ;;  %877 = vmatpush.msra.mxu1 %v1317_v11  ;;  %v251_v47 = vld [vmem:[%s2045_s2 + $0x58] sm:$0xff]  ;;  %v975_v62 = vpop.eup %974  ;;  %986 = vpow2.f32 %v443_v1  ;;  %p1092_p13 = pnand %p1091_p10, %p1087_p6 }
  0x35   : > { %878 = vmatpush.msra.mxu2 %v1317_v11  ;;  %879 = vmatpush.msra.mxu3 %v1317_v11  ;;  %v977_v6 = vpop.eup %976  ;;  %v1475_v4 = vadd.f32 1.0, %v975_v62  ;;  %v410_v11 = vsub.f32 0.0, %v1310_v10  ;;  %988 = vpow2.f32 %v419_v2  ;;  %v403_v10 = vsub.f32 0.0, %v1372_v21 }
  0x36   : > { %273 = vperm.xlu1 %972, %v243_v12   ;;  %288 = vperm.xlu0 %971, %v246_v13   ;;  %v408_v12 = vsub.f32 0.0, %v1332_v14  ;;  %v1479_v13 = vadd.f32 1.0, %v977_v6 }
  0x37   : > { %344 = vmatpush.msra.mxu0 %v1332_v14  ;;  %880 = vmatpush.msra.mxu1 %v1332_v14  ;;  %990 = vrcp.f32 %v1475_v4  ;;  %v435_v9 = vmul.f32 1.442695, %v410_v11  ;;  %vm470_vm0 = vweird.f32 %v1475_v4  ;;  %v476_v62 = vand.u32 2147483648, %v1475_v4 }
  0x38   : > { %881 = vmatpush.msra.mxu2 %v1332_v14  ;;  %882 = vmatpush.msra.mxu3 %v1332_v14  ;;  %992 = vpow2.f32 %v439_v7  ;;  %v474_v5 = vand.u32 2147483647, %v1475_v4  ;;  %vm530_vm3 = vweird.f32 %v1479_v13 }
  0x39   : > { %345 = vmatpush.msra.mxu0 %v1338_v15  ;;  %883 = vmatpush.msra.mxu1 %v1338_v15  ;;  %994 = vpow2.f32 %v427_v8 }
  0x3a   : > { %884 = vmatpush.msra.mxu2 %v1338_v15  ;;  %885 = vmatpush.msra.mxu3 %v1338_v15  ;;  %996 = vrcp.f32 %v1479_v13  ;;  %vm1582_vm4 = vcmp.eq.f32.partialorder %v474_v5, 8.507059e+37 }
  0x3b   : > { %346 = vmatpush.msra.mxu0 %v1344_v16  ;;  %886 = vmatpush.msra.mxu1 %v1344_v16 }
  0x3c   : > { %887 = vmatpush.msra.mxu2 %v1344_v16  ;;  %888 = vmatpush.msra.mxu3 %v1344_v16  ;;  %v979_v16 = vpop.eup %978 }
  0x3d   : > { %347 = vmatpush.msra.mxu0 %v1351_v17  ;;  %889 = vmatpush.msra.mxu1 %v1351_v17  ;;  %v1484_v14 = vadd.f32 1.0, %v979_v16 }
  0x3e   : > { %890 = vmatpush.msra.mxu2 %v1351_v17  ;;  %891 = vmatpush.msra.mxu3 %v1351_v17  ;;  %v437_v17 = vmul.f32 1.442695, %v411_v3 }
  0x3f   : > { %293 = vperm.xlu1 %972, %v247_v18   ;;  %303 = vperm.xlu0 %971, %v249_v19   ;;  %v981_v18 = vpop.eup %980  ;;  %v407_v19 = vsub.f32 0.0, %v1338_v15  ;;  %v404_v15 = vsub.f32 0.0, %v1366_v20  ;;  %vm650_vm9 = vweird.f32 %v1484_v14 }
  0x40   : > { %348 = vmatpush.msra.mxu0 %v1366_v20  ;;  %892 = vmatpush.msra.mxu1 %v1366_v20  ;;  %998 = vpow2.f32 %v437_v17 }
  0x41   : > { %893 = vmatpush.msra.mxu2 %v1366_v20  ;;  %894 = vmatpush.msra.mxu3 %v1366_v20  ;;  %1000 = vpow2.f32 %v435_v9 }
  0x42   : > { %349 = vmatpush.msra.mxu0 %v1372_v21  ;;  %895 = vmatpush.msra.mxu1 %v1372_v21 }
  0x43   : > { %896 = vmatpush.msra.mxu2 %v1372_v21  ;;  %897 = vmatpush.msra.mxu3 %v1372_v21 }
  0x44   : > { %350 = vmatpush.msra.mxu0 %v1378_v22  ;;  %898 = vmatpush.msra.mxu1 %v1378_v22 }
  0x45   : > { %899 = vmatpush.msra.mxu2 %v1378_v22  ;;  %900 = vmatpush.msra.mxu3 %v1378_v22  ;;  %v983_v22 = vpop.eup %982 }
  0x46   : > { %351 = vmatpush.msra.mxu0 %v208_v23  ;;  %901 = vmatpush.msra.mxu1 %v208_v23 }
  0x47   : > { %902 = vmatpush.msra.mxu2 %v208_v23  ;;  %903 = vmatpush.msra.mxu3 %v208_v23  ;;  %v431_v23 = vmul.f32 1.442695, %v408_v12 }
  0x48   : > { %352 = vmatmul.f32.vlgmr.msra.gmra.mxu0 %v224_v24  ;;  %364 = vmatmul.f32.vlgmr.msra.gmra.mxu1 %v228_v25  ;;  %v985_v24 = vpop.eup %984 }
  0x49   : > { %376 = vmatmul.f32.vlgmr.msra.gmra.mxu2 %v232_v26  ;;  %388 = vmatmul.f32.vlgmr.msra.gmra.mxu3 %v236_v27  ;;  %v987_v25 = vpop.eup %986  ;;  %v1487_v26 = vadd.f32 1.0, %v981_v18  ;;  %1002 = vpow2.f32 %v431_v23  ;;  %v477_v18 = vor.u32 1.1754944e-38, %v476_v62 }
  0x4a   : > { %278 = vperm.xlu2 %973, %v244_v28   ;;  %308 = vperm.xlu1 %972, %v250_v29   ;;  %v989_v27 = vpop.eup %988  ;;  %v429_v28 = vmul.f32 1.442695, %v407_v19  ;;  %1004 = vrcp.f32 %v1484_v14  ;;  %v536_v19 = vand.u32 2147483648, %v1479_v13 }
  0x4b   : > { %318 = vperm.xlu0 %971, %v252_v30   ;;  %v1489_v29 = vpop.eup %990  ;;  %v421_v30 = vmul.f32 1.442695, %v403_v10  ;;  %1006 = vrcp.f32 %v1487_v26  ;;  %vm590_vm6 = vweird.f32 %v1487_v26 }
  0x4c   : > { %1008 = vpow2.f32 %v429_v28  ;;  %vm471_vm1 = vweird.f32 %v1489_v29 }
  0x4d   : > { %1010 = vpow2.f32 %v421_v30  ;;  %vm1559_vm2 = vmor %vm470_vm0, %vm471_vm1 }
  0x50   : > { %355 = vmatmul.f32.gmra.mxu0 %v225_v31  ;;  %367 = vmatmul.f32.gmra.mxu1 %v229_v32  ;;  %v993_v31 = vpop.eup %992  ;;  %v1493_v32 = vadd.f32 1.0, %v983_v22 }
  0x51   : > { %379 = vmatmul.f32.gmra.mxu2 %v233_v33  ;;  %391 = vmatmul.f32.gmra.mxu3 %v237_v34  ;;  %v995_v21 = vpop.eup %994  ;;  %v1498_v34 = vadd.f32 1.0, %v989_v27  ;;  %v534_v27 = vand.u32 2147483647, %v1479_v13 }
  0x52   : > { %283 = vperm.xlu2 %973, %v245_v35   ;;  %323 = vperm.xlu1 %972, %v253_v36   ;;  %v1496_v33 = vpop.eup %996  ;;  %v466_v35 = vmul.f32 %v1489_v29, %v1475_v4  ;;  %1012 = vrcp.f32 %v1493_v32 }
  0x53   : > { %333 = vperm.xlu0 %971, %v255_v37   ;;  %v999_v36 = vpop.eup %998  ;;  %v423_v37 = vmul.f32 1.442695, %v404_v15  ;;  %1014 = vrcp.f32 %v1498_v34  ;;  %vm531_vm5 = vweird.f32 %v1496_v33  ;;  %vm1637_vm12 = vcmp.eq.f32.partialorder %v534_v27, 8.507059e+37 }
  0x54   : > { %v1001_v20 = vpop.eup %1000  ;;  %v1521_v49 = vadd.f32 1.0, %v999_v36  ;;  %vm1605_vm8 = vmor %vm530_vm3, %vm531_vm5  ;;  %vm485_vm15 = vweird.f32 %v1498_v34 }
  0x55   : > { %1016 = vpow2.f32 %v423_v37  ;;  %v1523_v51 = vadd.f32 1.0, %v1001_v20  ;;  %v537_v37 = vor.u32 1.1754944e-38, %v536_v19 }
  0x57   : > { %v609_v62 = vand.u32 2147483647, %v1523_v51 }
  0x58   : > { %358 = vmatmul.f32.gmra.mxu0 %v226_v38  ;;  %370 = vmatmul.f32.gmra.mxu1 %v230_v39  ;;  %v1502_v38 = vadd.f32 1.0, %v985_v24  ;;  %v1003_v39 = vpop.eup %1002 }
  0x59   : > { %382 = vmatmul.f32.gmra.mxu2 %v234_v40  ;;  %394 = vmatmul.f32.gmra.mxu3 %v238_v41  ;;  %v1505_v40 = vadd.f32 1.0, %v995_v21  ;;  %v526_v41 = vmul.f32 %v1496_v33, %v1479_v13  ;;  %v1527_v53 = vadd.f32 1.0, %v1003_v39  ;;  %v596_v21 = vand.u32 2147483648, %v1487_v26 }
  0x5a   : > { %298 = vperm.xlu2 %973, %v248_v42   ;;  %v1509_v42 = vpop.eup %1004  ;;  %1018 = vrcp.f32 %v1502_v38  ;;  %v654_v39 = vand.u32 2147483647, %v1484_v14 }
  0x5b   : > { %1020 = vrcp.f32 %v1505_v40  ;;  %v527_v52 = vsub.f32 1.0, %v526_v41  ;;  %v646_v58 = vmul.f32 %v1509_v42, %v1484_v14  ;;  %vm651_vm10 = vweird.f32 %v1509_v42 }
  0x5c   : > { %v656_v41 = vand.u32 2147483648, %v1484_v14  ;;  %vm1649_vm14 = vmor %vm650_vm9, %vm651_vm10  ;;  %vm1659_vm1 = vcmp.eq.f32.partialorder %v654_v39, 8.507059e+37  ;;  %v489_v14 = vand.u32 2147483647, %v1498_v34  ;;  %v549_v27 = vand.u32 2147483647, %v1505_v40 }
  0x5d   : > { %v528_v63 = vmul.f32 %v1496_v33, %v527_v52  ;;  %v647_v11 = vsub.f32 1.0, %v646_v58 }
  0x5e   : > { %vm1705_vm5 = vcmp.eq.f32.partialorder %v489_v14, 8.507059e+37  ;;  %vm1720_vm9 = vcmp.eq.f32.partialorder %v549_v27, 8.507059e+37 }
  0x5f   : > { %v529_v9 = vadd.f32 %v1496_v33, %v528_v63  ;;  %v648_v15 = vmul.f32 %v1509_v42, %v647_v11  ;;  %v657_v11 = vor.u32 1.1754944e-38, %v656_v41 }
  0x60   : > { %361 = vmatmul.f32.gmra.mxu0 %v227_v43  ;;  %373 = vmatmul.f32.gmra.mxu1 %v231_v44  ;;  %v1511_v43 = vadd.f32 1.0, %v987_v25  ;;  %v467_v44 = vsub.f32 1.0, %v466_v35 }
  0x61   : > { %385 = vmatmul.f32.gmra.mxu2 %v235_v45  ;;  %397 = vmatmul.f32.gmra.mxu3 %v239_v46  ;;  %v1514_v45 = vpop.eup %1006  ;;  %v1516_v46 = vadd.f32 1.0, %v993_v31 }
  0x62   : > { %313 = vperm.xlu2 %973, %v251_v47   ;;  %1022 = vrcp.f32 %v1511_v43  ;;  %v468_v54 = vmul.f32 %v1489_v29, %v467_v44  ;;  %v586_v57 = vmul.f32 %v1514_v45, %v1487_v26  ;;  %vm591_vm7 = vweird.f32 %v1514_v45 }
  0x63   : > { %1024 = vrcp.f32 %v1516_v46  ;;  %vm1628_vm11 = vmor %vm590_vm6, %vm591_vm7  ;;  %vm605_vm7 = vweird.f32 %v1523_v51 }
  0x64   : > { %1026 = vrcp.f32 %v1521_v49  ;;  %v469_v1 = vadd.f32 %v1489_v29, %v468_v54  ;;  %v587_v7 = vsub.f32 1.0, %v586_v57  ;;  %v649_v57 = vadd.f32 %v1509_v42, %v648_v15 }
  0x65   : > { %1028 = vrcp.f32 %v1523_v51  ;;  %v551_v15 = vand.u32 2147483648, %v1505_v40  ;;  %v611_v54 = vand.u32 2147483648, %v1523_v51 }
  0x66   : > { %1030 = vrcp.f32 %v1527_v53  ;;  %v473_v23 = vsel %vm1559_vm2, %v1489_v29, %v469_v1  ;;  %v588_v28 = vmul.f32 %v1514_v45, %v587_v7  ;;  %v594_v29 = vand.u32 2147483647, %v1487_v26 }
  0x67   : > { %v597_v26 = vor.u32 1.1754944e-38, %v596_v21  ;;  %vm545_vm2 = vweird.f32 %v1505_v40  ;;  %v612_v14 = vor.u32 1.1754944e-38, %v611_v54 }
  0x68   : > { %v589_v52 = vadd.f32 %v1514_v45, %v588_v28  ;;  %vm1641_vm13 = vcmp.eq.f32.partialorder %v594_v29, 8.507059e+37 }
  0x6a   : > { %328 = vperm.xlu2 %973, %v254_v48   ;;  %v1009_v48 = vpop.eup %1008  ;;  %v593_v19 = vsel %vm1628_vm11, %v1514_v45, %v589_v52  ;;  %vm665_vm11 = vweird.f32 %v1511_v43 }
  0x6b   : > { %v1011_v50 = vpop.eup %1010  ;;  %v1533_v56 = vadd.f32 1.0, %v1009_v48  ;;  %v1698_v21 = vsel %vm1641_vm13, %v597_v26, %v593_v19 }
  0x6c   : > { %v1530_v55 = vpop.eup %1012  ;;  %v1542_v60 = vadd.f32 1.0, %v1011_v50  ;;  %v1621_v50 = vsel %vm1582_vm4, %v477_v18, %v473_v23  ;;  %v653_v23 = vsel %vm1649_vm14, %v1509_v42, %v649_v57 }
  0x6d   : > { %v1539_v59 = vpop.eup %1014  ;;  %1032 = vrcp.f32 %v1533_v56  ;;  %v1702_v36 = vsel %vm1659_vm1, %v657_v11, %v653_v23  ;;  %v566_v52 = vand.u32 2147483648, %v1533_v56 }
  0x6e   : > { %v1017_v61 = vpop.eup %1016  ;;  %v481_v12 = vmul.f32 %v1539_v59, %v1498_v34  ;;  %1034 = vrcp.f32 %v1542_v60  ;;  %vm486_vm0 = vweird.f32 %v1539_v59  ;;  %vm500_vm13 = vweird.f32 %v1542_v60 }
  0x6f   : > { %v1549_v0 = vpop.eup %1018  ;;  %v1567_v16 = vadd.f32 1.0, %v1017_v61  ;;  %v533_v61 = vsel %vm1605_vm8, %v1496_v33, %v529_v9  ;;  %vm1690_vm4 = vmor %vm485_vm15, %vm486_vm0  ;;  %vm610_vm15 = vcmp.eq.f32.partialorder %v609_v62, 8.507059e+37  ;;  %v506_v42 = vand.u32 2147483648, %v1542_v60 }
  0x70   : > { %v1554_v2 = vpop.eup %1020  ;;  %v482_v30 = vsub.f32 1.0, %v481_v12  ;;  %v1684_v45 = vsel %vm1637_vm12, %v537_v37, %v533_v61 }
  0x71   : > { %v1565_v8 = vpop.eup %1022  ;;  %v541_v24 = vmul.f32 %v1554_v2, %v1505_v40  ;;  %1036 = vrcp.f32 %v1567_v16  ;;  %vm546_vm3 = vweird.f32 %v1554_v2 }
  0x72   : > { %v1570_v4 = vpop.eup %1024  ;;  %v483_v58 = vmul.f32 %v1539_v59, %v482_v30  ;;  %v661_v3 = vmul.f32 %v1565_v8, %v1511_v43  ;;  %vm1709_vm6 = vmor %vm545_vm2, %vm546_vm3  ;;  %vm666_vm12 = vweird.f32 %v1565_v8  ;;  %vm560_vm3 = vweird.f32 %v1533_v56 }
  0x73   : > { %v1577_v22 = vpop.eup %1026  ;;  %v542_v44 = vsub.f32 1.0, %v541_v24  ;;  %v491_v24 = vand.u32 2147483648, %v1498_v34  ;;  %vm1766_vm0 = vmor %vm665_vm11, %vm666_vm12  ;;  %vm681_vm11 = vweird.f32 %v1549_v0 }
  0x74   : > { %v1589_v25 = vpop.eup %1028  ;;  %v484_v10 = vadd.f32 %v1539_v59, %v483_v58  ;;  %v662_v29 = vsub.f32 1.0, %v661_v3  ;;  %v552_v58 = vor.u32 1.1754944e-38, %v551_v15  ;;  %v671_v3 = vand.u32 2147483648, %v1511_v43 }
  0x75   : > { %v1594_v31 = vpop.eup %1030  ;;  %v601_v48 = vmul.f32 %v1589_v25, %v1523_v51  ;;  %v543_v12 = vmul.f32 %v1554_v2, %v542_v44  ;;  %vm606_vm8 = vweird.f32 %v1589_v25  ;;  %v669_v51 = vand.u32 2147483647, %v1511_v43 }
  0x76   : > { %v1600_v35 = vpop.eup %1032  ;;  %v488_v44 = vsel %vm1690_vm4, %v1539_v59, %v484_v10  ;;  %v663_v63 = vmul.f32 %v1565_v8, %v662_v29  ;;  %vm1733_vm10 = vmor %vm605_vm7, %vm606_vm8  ;;  %vm620_vm8 = vweird.f32 %v1521_v49  ;;  %v684_v43 = vand.u32 2147483647, %v1502_v38 }
  0x77   : > { %v1611_v20 = vpop.eup %1034  ;;  %v602_v33 = vsub.f32 1.0, %v601_v48  ;;  %v544_v37 = vadd.f32 %v1554_v2, %v543_v12  ;;  %v556_v41 = vmul.f32 %v1600_v35, %v1533_v56  ;;  %v492_v48 = vor.u32 1.1754944e-38, %v491_v24 }
  0x78   : > { %v1665_v18 = vpop.eup %1036  ;;  %v496_v28 = vmul.f32 %v1611_v20, %v1542_v60  ;;  %vm501_vm14 = vweird.f32 %v1611_v20  ;;  %v664_v10 = vadd.f32 %v1565_v8, %v663_v63  ;;  %vm1775_vm1 = vcmp.eq.f32.partialorder %v669_v51, 8.507059e+37 }
  0x79   : > { %v603_v30 = vmul.f32 %v1589_v25, %v602_v33  ;;  %v548_v59 = vsel %vm1709_vm6, %v1554_v2, %v544_v37  ;;  %v557_v7 = vsub.f32 1.0, %v556_v41  ;;  %v616_v2 = vmul.f32 %v1577_v22, %v1521_v49  ;;  %vm1779_vm2 = vmor %vm500_vm13, %vm501_vm14 }
  0x7a   : > { %v497_v34 = vsub.f32 1.0, %v496_v28  ;;  %v1748_v11 = vsel %vm1705_vm5, %v492_v48, %v488_v44  ;;  %v1756_v19 = vsel %vm1720_vm9, %v552_v58, %v548_v59  ;;  %v504_v28 = vand.u32 2147483647, %v1542_v60 }
  0x7b   : > { %v604_v61 = vadd.f32 %v1589_v25, %v603_v30  ;;  %v672_v30 = vor.u32 1.1754944e-38, %v671_v3  ;;  %v558_v29 = vmul.f32 %v1600_v35, %v557_v7  ;;  %v617_v37 = vsub.f32 1.0, %v616_v2 }
  0x7c   : > { %v498_v1 = vmul.f32 %v1611_v20, %v497_v34  ;;  %vm561_vm4 = vweird.f32 %v1600_v35  ;;  %v564_v60 = vand.u32 2147483647, %v1533_v56  ;;  %v668_v48 = vsel %vm1766_vm0, %v1565_v8, %v664_v10 }
  0x7d   : > { %v608_v23 = vsel %vm1733_vm10, %v1589_v25, %v604_v61  ;;  %v676_v25 = vmul.f32 %v1549_v0, %v1502_v38  ;;  %vm1798_vm5 = vcmp.eq.f32.partialorder %v504_v28, 8.507059e+37  ;;  %v507_v61 = vor.u32 1.1754944e-38, %v506_v42  ;;  %vm1814_vm6 = vmor %vm560_vm3, %vm561_vm4 }
  0x7e   : > { %v499_v27 = vadd.f32 %v1611_v20, %v498_v1  ;;  %v1784_v40 = vsel %vm610_vm15, %v612_v14, %v608_v23  ;;  %v559_v8 = vadd.f32 %v1600_v35, %v558_v29  ;;  %v618_v59 = vmul.f32 %v1577_v22, %v617_v37 }
  0x7f   : > { %v677_v62 = vsub.f32 1.0, %v676_v25  ;;  %v1808_v26 = vsel %vm1775_vm1, %v672_v30, %v668_v48  ;;  %vm1818_vm7 = vcmp.eq.f32.partialorder %v564_v60, 8.507059e+37  ;;  %v567_v56 = vor.u32 1.1754944e-38, %v566_v52 }
  0x80   : > { %v503_v54 = vsel %vm1779_vm2, %v1611_v20, %v499_v27  ;;  %vm621_vm9 = vweird.f32 %v1577_v22  ;;  %v624_v51 = vand.u32 2147483647, %v1521_v49  ;;  %v571_v3 = vmul.f32 %v1594_v31, %v1527_v53 }
  0x81   : > { %v1839_v2 = vsel %vm1798_vm5, %v507_v61, %v503_v54  ;;  %v626_v14 = vand.u32 2147483648, %v1521_v49  ;;  %v678_v23 = vmul.f32 %v1549_v0, %v677_v62  ;;  %vm680_vm10 = vweird.f32 %v1502_v38  ;;  %vm1859_vm12 = vmor %vm620_vm8, %vm621_vm9 }
  0x82   : > { %v563_v28 = vsel %vm1814_vm6, %v1600_v35, %v559_v8  ;;  %v619_v42 = vadd.f32 %v1577_v22, %v618_v59  ;;  %v686_v29 = vand.u32 2147483648, %v1502_v38  ;;  %v572_v60 = vsub.f32 1.0, %v571_v3  ;;  %vm1877_vm14 = vmor %vm680_vm10, %vm681_vm11 }
  0x83   : > { %vm1863_vm13 = vcmp.eq.f32.partialorder %v624_v51, 8.507059e+37  ;;  %v568_v49 = vsel %vm1818_vm7, %v567_v56, %v563_v28  ;;  %v631_v54 = vmul.f32 %v1570_v4, %v1516_v46  ;;  %vm515_vm15 = vweird.f32 %v1567_v16 }
  0x84   : > { %vm516_vm0 = vweird.f32 %v1665_v18  ;;  %v623_v38 = vsel %vm1859_vm12, %v1577_v22, %v619_v42  ;;  %vm1895_vm1 = vcmp.eq.f32.partialorder %v684_v43, 8.507059e+37  ;;  %v687_v62 = vor.u32 1.1754944e-38, %v686_v29 }
  0x85   : > { %v519_v8 = vand.u32 2147483647, %v1567_v16  ;;  %v521_v59 = vand.u32 2147483648, %v1567_v16  ;;  %vm575_vm2 = vweird.f32 %v1527_v53  ;;  %vm576_vm3 = vweird.f32 %v1594_v31  ;;  %vm1919_vm4 = vmor %vm515_vm15, %vm516_vm0 }
  0x86   : > { %v632_v56 = vsub.f32 1.0, %v631_v54  ;;  %vm1935_vm6 = vmor %vm575_vm2, %vm576_vm3  ;;  %vm635_vm8 = vweird.f32 %v1516_v46  ;;  %vm636_vm9 = vweird.f32 %v1570_v4  ;;  %vm695_vm10 = vweird.f32 %v1493_v32 }
  0x87   : > { %vm1927_vm5 = vcmp.eq.f32.partialorder %v519_v8, 8.507059e+37  ;;  %vm696_vm11 = vweird.f32 %v1530_v55  ;;  %v701_v48 = vand.u32 2147483648, %v1493_v32  ;;  %vm1975_vm12 = vmor %vm635_vm8, %vm636_vm9  ;;  %v699_v52 = vand.u32 2147483647, %v1493_v32 }
  0x89   : > { %vm700_vm15 = vcmp.eq.f32.partialorder %v699_v52, 8.507059e+37 }
  0x96   : > { %v1518_v47 = vpop.permute.xlu0 %258 }
  0x9f   : > { %v1557_v6 = vpop.permute.xlu1 %268  ;;  %v1572_v17 = vpop.permute.xlu0 %263 }
  0xa4   : > { %v1617_v13 = vpop.permute.xlu2 %278 }
  0xa8   : > { %v1653_v5 = vpop.permute.xlu1 %273  ;;  %v1667_v9 = vpop.permute.xlu0 %288 }
  0xac   : > { %v1725_v57 = vpop.permute.xlu2 %283 }
  0xb1   : > { %v1740_v33 = vpop.permute.xlu1 %293  ;;  %v1752_v12 = vpop.permute.xlu0 %303 }
  0xbc   : > { %v1825_v1 = vpop.permute.xlu1 %308 }
  0xbd   : > { %v319_v10 = vpop.permute.xlu0 %318 }
  0xc4   : > { %v324_v22 = vpop.permute.xlu1 %323 }
  0xc5   : > { %v353_v34 = vpop.f32.mrf.mxu0  ;;  %v365_v39 = vpop.f32.mrf.mxu1 }
  0xc6   : > { %v354_v41 = vadd.f32 %v353_v34, %v1518_v47  ;;  %v366_v44 = vadd.f32 %v365_v39, %v1617_v13  ;;  %v299_v47 = vpop.permute.xlu2 %298 }
  0xc8   : > { %v705_v13 = vmul.f32 %v1621_v50, %v354_v41  ;;  %v709_v63 = vmul.f32 %v1684_v45, %v366_v44  ;;  %v511_v45 = vmul.f32 %v1665_v18, %v1567_v16 }
  0xca   : > { %721 = vst [vmem:[%s1829_s4] sm:$0xff] %v705_v13  ;;  %v512_v37 = vsub.f32 1.0, %v511_v45  ;;  %v579_v45 = vand.u32 2147483647, %v1527_v53 }
  0xcb   : > { %725 = vst [vmem:[%s1829_s4 + $0x20] sm:$0xff] %v709_v63 }
  0xcc   : > { %v377_v7 = vpop.f32.mrf.mxu2  ;;  %v389_v27 = vpop.f32.mrf.mxu3  ;;  %vm1953_vm7 = vcmp.eq.f32.partialorder %v579_v45, 8.507059e+37 }
  0xcd   : > { %v378_v24 = vadd.f32 %v377_v7, %v299_v47  ;;  %v390_v25 = vadd.f32 %v389_v27, %v319_v10  ;;  %v356_v15 = vpop.f32.mrf.mxu0  ;;  %v368_v30 = vpop.f32.mrf.mxu1  ;;  %v573_v47 = vmul.f32 %v1594_v31, %v572_v60 }
  0xce   : > { %v357_v39 = vadd.f32 %v356_v15, %v1572_v17  ;;  %v369_v35 = vadd.f32 %v368_v30, %v1725_v57  ;;  %v679_v17 = vadd.f32 %v1549_v0, %v678_v23  ;;  %v1889_v58 = vpop.permute.xlu2 %313  ;;  %v633_v15 = vmul.f32 %v1570_v4, %v632_v56 }
  0xcf   : > { %v713_v34 = vmul.f32 %v1698_v21, %v378_v24  ;;  %v717_v41 = vmul.f32 %v1702_v36, %v390_v25  ;;  %v627_v21 = vor.u32 1.1754944e-38, %v626_v14  ;;  %v581_v14 = vand.u32 2147483648, %v1527_v53 }
  0xd0   : > { %v706_v57 = vmul.f32 %v1748_v11, %v357_v39  ;;  %v710_v36 = vmul.f32 %v1756_v19, %v369_v35  ;;  %v513_v11 = vmul.f32 %v1665_v18, %v512_v37  ;;  %v691_v19 = vmul.f32 %v1530_v55, %v1493_v32 }
  0xd1   : > { %729 = vst [vmem:[%s1829_s4 + $0x40] sm:$0xff] %v713_v34  ;;  %v683_v63 = vsel %vm1877_vm14, %v1549_v0, %v679_v17  ;;  %v574_v28 = vadd.f32 %v1594_v31, %v573_v47  ;;  %v522_v25 = vor.u32 1.1754944e-38, %v521_v59  ;;  %v582_v43 = vor.u32 1.1754944e-38, %v581_v14 }
  0xd2   : > { %733 = vst [vmem:[%s1829_s4 + $0x60] sm:$0xff] %v717_v41  ;;  %v514_v0 = vadd.f32 %v1665_v18, %v513_v11  ;;  %v692_v23 = vsub.f32 1.0, %v691_v19  ;;  %v688_v30 = vsel %vm1895_vm1, %v687_v62, %v683_v63  ;;  %v641_v39 = vand.u32 2147483648, %v1516_v46 }
  0xd3   : > { %722 = vst [vmem:[%s1829_s4 + $0x8] sm:$0xff] %v706_v57  ;;  %v634_v44 = vadd.f32 %v1570_v4, %v633_v15 }
  0xd4   : > { %726 = vst [vmem:[%s1829_s4 + $0x28] sm:$0xff] %v710_v36  ;;  %v380_v13 = vpop.f32.mrf.mxu2  ;;  %v392_v50 = vpop.f32.mrf.mxu3  ;;  %v518_v53 = vsel %vm1919_vm4, %v1665_v18, %v514_v0  ;;  %v693_v29 = vmul.f32 %v1530_v55, %v692_v23  ;;  %v639_v18 = vand.u32 2147483647, %v1516_v46  ;;  %v642_v61 = vor.u32 1.1754944e-38, %v641_v39 }
  0xd5   : > { %v381_v20 = vadd.f32 %v380_v13, %v1752_v12  ;;  %v393_v51 = vadd.f32 %v392_v50, %v324_v22  ;;  %v359_v3 = vpop.f32.mrf.mxu0  ;;  %v371_v7 = vpop.f32.mrf.mxu1  ;;  %v523_v41 = vsel %vm1927_vm5, %v522_v25, %v518_v53 }
  0xd6   : > { %v360_v12 = vadd.f32 %v359_v3, %v1557_v6  ;;  %v372_v24 = vadd.f32 %v371_v7, %v1667_v9  ;;  %vm640_vm14 = vcmp.eq.f32.partialorder %v639_v18, 8.507059e+37 }
  0xd7   : > { %v714_v10 = vmul.f32 %v1784_v40, %v381_v20  ;;  %v718_v42 = vmul.f32 %v1808_v26, %v393_v51  ;;  %v628_v40 = vsel %vm1863_vm13, %v627_v21, %v623_v38  ;;  %vm1988_vm13 = vmor %vm695_vm10, %vm696_vm11 }
  0xd8   : > { %v707_v9 = vmul.f32 %v1839_v2, %v360_v12  ;;  %v711_v26 = vmul.f32 %v568_v49, %v372_v24  ;;  %v578_v2 = vsel %vm1935_vm6, %v1594_v31, %v574_v28  ;;  %v329_v31 = vpop.permute.xlu2 %328  ;;  %v694_v49 = vadd.f32 %v1530_v55, %v693_v29 }
  0xd9   : > { %730 = vst [vmem:[%s1829_s4 + $0x48] sm:$0xff] %v714_v10  ;;  %v583_v36 = vsel %vm1953_vm7, %v582_v43, %v578_v2 }
  0xda   : > { %734 = vst [vmem:[%s1829_s4 + $0x68] sm:$0xff] %v718_v42  ;;  %v698_v32 = vsel %vm1988_vm13, %v1530_v55, %v694_v49 }
  0xdb   : > { %723 = vst [vmem:[%s1829_s4 + $0x10] sm:$0xff] %v707_v9 }
  0xdc   : > { %727 = vst [vmem:[%s1829_s4 + $0x30] sm:$0xff] %v711_v26  ;;  %v383_v34 = vpop.f32.mrf.mxu2  ;;  %v395_v60 = vpop.f32.mrf.mxu3 }
  0xdd   : > { %v384_v35 = vadd.f32 %v383_v34, %v1825_v1  ;;  %v396_v21 = vadd.f32 %v395_v60, %v329_v31  ;;  %v362_v17 = vpop.f32.mrf.mxu0  ;;  %v374_v57 = vpop.f32.mrf.mxu1 }
  0xde   : > { %v363_v11 = vadd.f32 %v362_v17, %v1653_v5  ;;  %v375_v19 = vadd.f32 %v374_v57, %v1740_v33  ;;  %v638_v5 = vsel %vm1975_vm12, %v1570_v4, %v634_v44  ;;  %v702_v33 = vor.u32 1.1754944e-38, %v701_v48  ;;  %v334_v4 = vpop.permute.xlu0 %333 }
  0xdf   : > { %v715_v54 = vmul.f32 %v628_v40, %v384_v35  ;;  %v719_v38 = vmul.f32 %v688_v30, %v396_v21  ;;  %v643_v63 = vsel %vm640_vm14, %v642_v61, %v638_v5 }
  0xe0   : > { %v708_v62 = vmul.f32 %v523_v41, %v363_v11  ;;  %v712_v47 = vmul.f32 %v583_v36, %v375_v19  ;;  %v703_v22 = vsel %vm700_vm15, %v702_v33, %v698_v32 }
  0xe1   : > { %731 = vst [vmem:[%s1829_s4 + $0x50] sm:$0xff] %v715_v54 }
  0xe2   : > { %735 = vst [vmem:[%s1829_s4 + $0x70] sm:$0xff] %v719_v38 }
  0xe3   : > { %724 = vst [vmem:[%s1829_s4 + $0x18] sm:$0xff] %v708_v62 }
  0xe4   : > { %728 = vst [vmem:[%s1829_s4 + $0x38] sm:$0xff] %v712_v47  ;;  %v386_v13 = vpop.f32.mrf.mxu2  ;;  %v398_v59 = vpop.f32.mrf.mxu3 }
  0xe5   : > { %v387_v8 = vadd.f32 %v386_v13, %v1889_v58  ;;  %v399_v20 = vadd.f32 %v398_v59, %v334_v4 }
  0xe7   : > { %v716_v50 = vmul.f32 %v643_v63, %v387_v8  ;;  %v720_v55 = vmul.f32 %v703_v22, %v399_v20 }
  0xe9   : > { %732 = vst [vmem:[%s1829_s4 + $0x58] sm:$0xff] %v716_v50 }
  0xea   : > { %736 = vst [vmem:[%s1829_s4 + $0x78] sm:$0xff] %v720_v55 }
  0xeb   : > { %1095 = shalt.err (!%p1092_p13)
}
  0xec   : > { %s1155_s19 = smov 128   ;;  %s1156_s30 = smov 8  }
  0xed   : > { %906 = dma.vmem_to_hbm [thread:$0]  (%p1228_p9), %s752_s7, 2048, %s754_s8, %s738_s9, %s1155_s19, %s1155_s19, %s1156_s30  }
  0xee PF: > { %s768_s22 = sand.u32 1, %s1130_s12   ;;  %p913_p0 = pnand %p842_p12, %p1235_p11 }
  0xef   : > { %s769_s4 = scalar_lea.sflag [#allocation4], %s768_s22 }
  0xf0   : > { %p914_p1 = pneg %p913_p0 }
  0xf2   : > { %1125 = dma.done.wait (%p914_p1), %s769_s4, 2048  }
  0xf3   : > { %1127 = vsyncadd (%p914_p1), %s769_s4, 4294965248  ;;  %s19_s17 = sadd.s32 1, %s1150_s17   ;;  %s2109_s12 = smov %s1134_s13 }
  0xf4   : > { %p16_p2 = scmp.ge.s32.totalorder %s19_s17, 4   ;;  %s2110_s13 = smov %s1138_s14 }
  0xf5   : > { %s2111_s14 = smov %s1233_s26  ;;  %s2112_s15 = smov %s1146_s16 }
  0xf6   : > { %s2113_s16 = smov %s2115_s20  ;;  %18 = sbr.rel (!%p16_p2) target bundleno = 6 (0x6), region = 77 }
  0xfb   :  { %775 = vsyncpa [#allocation3], 1 }
  0xfc   :  { %777 = vsyncpa [#allocation3 + $0x1], 1 }
  0xfd   :  { %778 = vsyncpa [#allocation4], 1 }
  0xfe   :  { %780 = vsyncpa [#allocation4 + $0x1], 1 }

</bundles_post_ra>
